<compile_context>
chip_gen: v5e
topology: v5e:2x2
jax: 0.10.0
libtpu: 0.0.40
codegen_flags: <defaults>
</compile_context>

<pallas_src>
import functools

import jax
import jax.numpy as jnp
import numpy as np
from jax.experimental import pallas as pl
from jax.experimental.pallas import tpu as pltpu

IGNORE_INDEX = 255


def _focal_partial_kernel(x_ref, t_ref, out_ref, *, hw, tm, n_images, bn,
                          mask_pix, mask_batch):
    """One (batch-tile, pixel-tile) grid cell -> packed (sum of NLL, valid count)."""
    logits = x_ref[...].astype(jnp.float32)          # (bn, C, tm): classes on sublanes
    tgt = t_ref[...].astype(jnp.int32)               # (bn, 1, tm), cast in-kernel

    # Pixel validity. Tail masks are emitted only when the tile does not divide
    # the extent (static flags), so divisible grids carry no iota/compare filler.
    valid = tgt != IGNORE_INDEX                      # (bn, 1, tm)
    if mask_pix:
        ti = pl.program_id(1)
        pix = ti * tm + jax.lax.broadcasted_iota(jnp.int32, tgt.shape, 2)
        valid = valid & (pix < hw)
    if mask_batch:
        bi = pl.program_id(0)
        img = bi * bn + jax.lax.broadcasted_iota(jnp.int32, tgt.shape, 0)
        valid = valid & (img < n_images)
    safe_tgt = jnp.where(valid, tgt, 0)

    # Numerically stable log-softmax over the class (sublane) axis, per pixel.
    m = jnp.max(logits, axis=1, keepdims=True)                        # (bn, 1, tm)
    z = logits - m
    lse = jnp.log(jnp.sum(jnp.exp(z), axis=1, keepdims=True))         # (bn, 1, tm)

    # Gather the target-class logit via a one-hot compare (no dynamic gather on TPU).
    cls = jax.lax.broadcasted_iota(jnp.int32, logits.shape, 1)        # (bn, C, tm)
    z_t = jnp.sum(jnp.where(cls == safe_tgt, z, 0.0), axis=1, keepdims=True)

    nll = lse - z_t                                   # -log_softmax[target], (bn,1,tm)
    per_px = jnp.where(valid, nll, 0.0)               # select (not mul) drops garbage

    s = jnp.sum(per_px, keepdims=True)                         # (1, 1, 1)
    cnt = jnp.sum(valid.astype(jnp.float32), keepdims=True)    # (1, 1, 1)

    # Pack (sum, count) into a single (2, 128) block: one store, one writeback DMA.
    row = jax.lax.broadcasted_iota(jnp.int32, (2, 128), 0)
    out_ref[...] = jnp.where(row == 0,
                             jnp.broadcast_to(s[0], (2, 128)),
                             jnp.broadcast_to(cnt[0], (2, 128)))


def _select_tiling(n, c, hw, in_itemsize, tgt_itemsize, step_bytes, vmem_budget):
    """Pick (bn, tm): pixels/step sized by bytes, capped by an in-kernel VMEM estimate."""
    # Pixels per step so the raw logits block reaches ~step_bytes.
    px_step = max(128, step_bytes // (c * in_itemsize))
    # VMEM cost per pixel-column per step:
    #   2x double-buffered logits block + 2x double-buffered target block
    #   + int32 target cast + ~4 f32 (C,) temporaries (upcast / z / exp / one-hot)
    per_px = 2 * c * in_itemsize + 2 * tgt_itemsize + 4 + 4 * c * 4
    px_vmem = max(128, vmem_budget // per_px)
    px = min(px_step, px_vmem)

    if hw <= px:
        tm = hw                                   # full pixel dim: always a legal block
        bn = min(n, max(1, px // hw))             # batch several images per step
    else:
        tm = max(128, (px // 128) * 128)          # multiple of 128
        bn = 1
    return bn, tm


def focal_loss(x, target, *, gamma=2,
               step_bytes=4 * 1024 * 1024,
               vmem_budget_bytes=40 * 1024 * 1024):
    """x: (N, C, H, W) float (any dtype), target: (N, H, W) int, ignore index 255."""
    n, c, h, w = x.shape
    hw = h * w

    # Free re-layouts only: merge H,W; no transpose / pad / dtype cast in the wrapper.
    xr = x.reshape(n, c, hw)
    tr = target.reshape(n, 1, hw)                 # native dtype, cast inside the kernel

    bn, tm = _select_tiling(n, c, hw, x.dtype.itemsize, tr.dtype.itemsize,
                            step_bytes, vmem_budget_bytes)
    gb = pl.cdiv(n, bn)
    gt = pl.cdiv(hw, tm)
    mask_pix = (hw % tm) != 0
    mask_batch = (n % bn) != 0

    # Explicit scoped-VMEM limit: double-buffered blocks + f32 temporaries + margin.
    blk_in = bn * c * tm * x.dtype.itemsize
    blk_tg = bn * tm * tr.dtype.itemsize
    est = (2 * blk_in + 2 * blk_tg          # double-buffered input DMAs
           + bn * tm * 4                    # int32 target cast
           + 4 * bn * c * tm * 4            # f32 temporaries (upcast/z/exp/one-hot)
           + 2 * 2 * 128 * 4)               # packed output block (double-buffered)
    vmem_limit = int(min(56 * 1024 * 1024, max(est + (4 << 20), 16 << 20)))

    out = pl.pallas_call(
        functools.partial(_focal_partial_kernel, hw=hw, tm=tm, n_images=n, bn=bn,
                          mask_pix=mask_pix, mask_batch=mask_batch),
        out_shape=jax.ShapeDtypeStruct((gb, gt, 2, 128), jnp.float32),
        grid_spec=pltpu.PrefetchScalarGridSpec(
            num_scalar_prefetch=0,
            grid=(gb, gt),
            in_specs=[
                pl.BlockSpec((bn, c, tm), lambda i, j: (i, 0, j)),
                pl.BlockSpec((bn, 1, tm), lambda i, j: (i, 0, j)),
            ],
            out_specs=pl.BlockSpec((None, None, 2, 128), lambda i, j: (i, j, 0, 0)),
        ),
        compiler_params=pltpu.CompilerParams(
            dimension_semantics=("parallel", "parallel"),
            vmem_limit_bytes=vmem_limit),
    )(xr, tr)

    total = jnp.sum(out[:, :, 0, 0])
    # Per-tile counts are exact in f32 (< 2^24); sum them as int32 so the
    # denominator stays exact for arbitrarily many valid pixels.
    count = jnp.sum(out[:, :, 1, 0].astype(jnp.int32))
    ce = total / count.astype(jnp.float32)        # NaN (0/0) if all pixels ignored
    p = jnp.exp(-ce)
    return ((1.0 - p) ** gamma) * ce


def _focal_loss_ref(x, target, gamma=2):
    """Pure-JAX reference mirroring torch.nn.CrossEntropyLoss(ignore_index=255)."""
    nb, c, h, w = x.shape
    xf = jnp.transpose(x, (0, 2, 3, 1)).reshape(-1, c).astype(jnp.float32)
    tf = target.reshape(-1).astype(jnp.int32)
    valid = tf != IGNORE_INDEX
    safe = jnp.where(valid, tf, 0)
    logp = jax.nn.log_softmax(xf, axis=-1)
    nll = -jnp.take_along_axis(logp, safe[:, None], axis=-1)[:, 0]
    ce = jnp.sum(jnp.where(valid, nll, 0.0)) / jnp.sum(valid.astype(jnp.float32))
    p = jnp.exp(-ce)
    return ((1.0 - p) ** gamma) * ce


if __name__ == "__main__":
    # --- main test: N=2, C=4, H=W=16 (single grid step: bn=2, tm=256) ------
    k_x, k_t, k_m = jax.random.split(jax.random.PRNGKey(0), 3)
    N, C, H, W = 2, 4, 16, 16
    x = jax.random.normal(k_x, (N, C, H, W), dtype=jnp.float32)
    target = jax.random.randint(k_t, (N, H, W), 0, C, dtype=jnp.int32)
    target = jnp.where(jax.random.uniform(k_m, (N, H, W)) < 0.1, IGNORE_INDEX, target)

    out = jax.block_until_ready(focal_loss(x, target, gamma=2))
    ref = jax.block_until_ready(_focal_loss_ref(x, target, gamma=2))
    assert np.allclose(np.asarray(out), np.asarray(ref), rtol=1e-5, atol=1e-5), (out, ref)

    # --- pixel-tail test: HW=240 forced onto 128-pixel tiles ----------------
    k_x2, k_t2, k_m2 = jax.random.split(jax.random.PRNGKey(1), 3)
    N2, C2, H2, W2 = 1, 5, 12, 20
    x2 = jax.random.normal(k_x2, (N2, C2, H2, W2), dtype=jnp.float32)
    t2 = jax.random.randint(k_t2, (N2, H2, W2), 0, C2, dtype=jnp.int32)
    t2 = jnp.where(jax.random.uniform(k_m2, (N2, H2, W2)) < 0.15, IGNORE_INDEX, t2)

    out2 = jax.block_until_ready(
        focal_loss(x2, t2, gamma=2, step_bytes=128 * C2 * 4))   # forces tm=128, gt=2
    ref2 = jax.block_until_ready(_focal_loss_ref(x2, t2, gamma=2))
    assert np.allclose(np.asarray(out2), np.asarray(ref2), rtol=1e-5, atol=1e-5), (out2, ref2)

    # --- batch-tail + uint8-target test: N=3 batched two-per-step -----------
    k_x3, k_t3, k_m3 = jax.random.split(jax.random.PRNGKey(2), 3)
    N3, C3, H3, W3 = 3, 4, 8, 8
    x3 = jax.random.normal(k_x3, (N3, C3, H3, W3), dtype=jnp.float32)
    t3 = jax.random.randint(k_t3, (N3, H3, W3), 0, C3, dtype=jnp.int32)
    t3 = jnp.where(jax.random.uniform(k_m3, (N3, H3, W3)) < 0.2, IGNORE_INDEX, t3)
    t3 = t3.astype(jnp.uint8)                                   # native-dtype target path

    out3 = jax.block_until_ready(
        focal_loss(x3, t3, gamma=2, step_bytes=128 * C3 * 4))   # forces bn=2, gb=2
    ref3 = jax.block_until_ready(_focal_loss_ref(x3, t3, gamma=2))
    assert np.allclose(np.asarray(out3), np.asarray(ref3), rtol=1e-5, atol=1e-5), (out3, ref3)

    print("KERNEL_OK")
</pallas_src>

<mosaic_0001>
module attributes {stable_mosaic.version = 11 : i64} {
  func.func @_focal_partial_kernel(%arg0: i32, %arg1: i32, %arg2: memref<2x4x256xf32, #tpu.memory_space<vmem>>, %arg3: memref<2x1x256xi32, #tpu.memory_space<vmem>>, %arg4: memref<1x1x2x128xf32, #tpu.memory_space<vmem>>) attributes {dimension_semantics = [#tpu.dimension_semantics<parallel>, #tpu.dimension_semantics<parallel>], iteration_bounds = array<i64: 1, 1>, scalar_prefetch = 0 : i64, scratch_operands = 0 : i64, tpu.core_type = #tpu.core_type<tc>, window_params = [{transform_indices = @transform_0, window_bounds = array<i64: 2, 4, 256>}, {transform_indices = @transform_1, window_bounds = array<i64: 2, 1, 256>}, {transform_indices = @transform_2, window_bounds = array<i64: 1, 1, 2, 128>}]} {
    %c0 = arith.constant 0 : index
    %c0_0 = arith.constant 0 : index
    %c0_1 = arith.constant 0 : index
    %0 = vector.load %arg2[%c0, %c0_0, %c0_1] : memref<2x4x256xf32, #tpu.memory_space<vmem>>, vector<2x4x256xf32>
    %c0_2 = arith.constant 0 : index
    %c0_3 = arith.constant 0 : index
    %c0_4 = arith.constant 0 : index
    %1 = vector.load %arg3[%c0_2, %c0_3, %c0_4] : memref<2x1x256xi32, #tpu.memory_space<vmem>>, vector<2x1x256xi32>
    %c255_i32 = arith.constant 255 : i32
    %2 = vector.broadcast %c255_i32 : i32 to vector<2x1x256xi32>
    %3 = arith.cmpi ne, %1, %2 : vector<2x1x256xi32>
    %c0_i32 = arith.constant 0 : i32
    %4 = vector.broadcast %c0_i32 : i32 to vector<2x1x256xi32>
    %5 = arith.select %3, %1, %4 : vector<2x1x256xi1>, vector<2x1x256xi32>
    %cst = arith.constant dense<0xFF800000> : vector<2x256xf32>
    %6 = vector.multi_reduction <maximumf>, %0, %cst [1] : vector<2x4x256xf32> to vector<2x256xf32>
    %7 = vector.shape_cast %6 : vector<2x256xf32> to vector<2x1x256xf32>
    %8 = vector.broadcast %7 : vector<2x1x256xf32> to vector<2x4x256xf32>
    %9 = arith.subf %0, %8 : vector<2x4x256xf32>
    %10 = math.exp %9 : vector<2x4x256xf32>
    %cst_5 = arith.constant dense<0.000000e+00> : vector<2x256xf32>
    %11 = vector.multi_reduction <add>, %10, %cst_5 [1] : vector<2x4x256xf32> to vector<2x256xf32>
    %12 = vector.shape_cast %11 : vector<2x256xf32> to vector<2x1x256xf32>
    %13 = math.log %12 : vector<2x1x256xf32>
    %14 = tpu.iota {dimensions = array<i32: 1>} : vector<2x4x256xi32>
    %15 = vector.broadcast %5 : vector<2x1x256xi32> to vector<2x4x256xi32>
    %16 = arith.cmpi eq, %14, %15 : vector<2x4x256xi32>
    %cst_6 = arith.constant 0.000000e+00 : f32
    %17 = vector.broadcast %cst_6 : f32 to vector<2x4x256xf32>
    %18 = arith.select %16, %9, %17 : vector<2x4x256xi1>, vector<2x4x256xf32>
    %cst_7 = arith.constant dense<0.000000e+00> : vector<2x256xf32>
    %19 = vector.multi_reduction <add>, %18, %cst_7 [1] : vector<2x4x256xf32> to vector<2x256xf32>
    %20 = vector.shape_cast %19 : vector<2x256xf32> to vector<2x1x256xf32>
    %21 = arith.subf %13, %20 : vector<2x1x256xf32>
    %cst_8 = arith.constant 0.000000e+00 : f32
    %22 = vector.broadcast %cst_8 : f32 to vector<2x1x256xf32>
    %23 = arith.select %3, %21, %22 : vector<2x1x256xi1>, vector<2x1x256xf32>
    %24 = vector.shape_cast %23 : vector<2x1x256xf32> to vector<1x2x1x256xf32>
    %cst_9 = arith.constant dense<0.000000e+00> : vector<1xf32>
    %25 = vector.multi_reduction <add>, %24, %cst_9 [1, 2, 3] : vector<1x2x1x256xf32> to vector<1xf32>
    %26 = vector.shape_cast %25 : vector<1xf32> to vector<1x1x1x1xf32>
    %27 = vector.extract %26[0, 0, 0, 0] : f32 from vector<1x1x1x1xf32>
    %28 = vector.broadcast %27 : f32 to vector<1x1x1xf32>
    %29 = arith.extui %3 : vector<2x1x256xi1> to vector<2x1x256xi32>
    %30 = arith.sitofp %29 : vector<2x1x256xi32> to vector<2x1x256xf32>
    %31 = vector.shape_cast %30 : vector<2x1x256xf32> to vector<1x2x1x256xf32>
    %cst_10 = arith.constant dense<0.000000e+00> : vector<1xf32>
    %32 = vector.multi_reduction <add>, %31, %cst_10 [1, 2, 3] : vector<1x2x1x256xf32> to vector<1xf32>
    %33 = vector.shape_cast %32 : vector<1xf32> to vector<1x1x1x1xf32>
    %34 = vector.extract %33[0, 0, 0, 0] : f32 from vector<1x1x1x1xf32>
    %35 = vector.broadcast %34 : f32 to vector<1x1x1xf32>
    %36 = tpu.iota {dimensions = array<i32: 0>} : vector<2x128xi32>
    %c0_i32_11 = arith.constant 0 : i32
    %37 = vector.broadcast %c0_i32_11 : i32 to vector<2x128xi32>
    %38 = arith.cmpi eq, %36, %37 : vector<2x128xi32>
    %39 = vector.shape_cast %28 : vector<1x1x1xf32> to vector<1x1xf32>
    %40 = vector.shape_cast %39 : vector<1x1xf32> to vector<1x1xf32>
    %41 = vector.broadcast %40 : vector<1x1xf32> to vector<2x128xf32>
    %42 = vector.shape_cast %35 : vector<1x1x1xf32> to vector<1x1xf32>
    %43 = vector.shape_cast %42 : vector<1x1xf32> to vector<1x1xf32>
    %44 = vector.broadcast %43 : vector<1x1xf32> to vector<2x128xf32>
    %45 = arith.select %38, %41, %44 : vector<2x128xi1>, vector<2x128xf32>
    %c0_12 = arith.constant 0 : index
    %c0_13 = arith.constant 0 : index
    %c0_14 = arith.constant 0 : index
    %c0_15 = arith.constant 0 : index
    %46 = vector.load %arg4[%c0_12, %c0_13, %c0_14, %c0_15] : memref<1x1x2x128xf32, #tpu.memory_space<vmem>>, vector<1x1x2x128xf32>
    %47 = vector.shape_cast %46 : vector<1x1x2x128xf32> to vector<2x128xf32>
    %48 = vector.shape_cast %45 : vector<2x128xf32> to vector<1x1x2x128xf32>
    tpu.vector_store %arg4[%c0_12, %c0_13, %c0_14, %c0_15], %48 {strides = array<i32>} : memref<1x1x2x128xf32, #tpu.memory_space<vmem>>, vector<1x1x2x128xf32>,
    return
  }
  func.func @transform_0(%arg0: i32, %arg1: i32) -> (i32, i32, i32) {
    %c0_i32 = arith.constant 0 : i32
    %c0_i32_0 = arith.constant 0 : i32
    return %arg0, %c0_i32, %arg1 : i32, i32, i32
  }
  func.func @transform_1(%arg0: i32, %arg1: i32) -> (i32, i32, i32) {
    %c0_i32 = arith.constant 0 : i32
    %c0_i32_0 = arith.constant 0 : i32
    return %arg0, %c0_i32, %arg1 : i32, i32, i32
  }
  func.func @transform_2(%arg0: i32, %arg1: i32) -> (i32, i32, i32, i32) {
    %c0_i32 = arith.constant 0 : i32
    %c0_i32_0 = arith.constant 0 : i32
    %c0_i32_1 = arith.constant 0 : i32
    return %arg0, %arg1, %c0_i32, %c0_i32_0 : i32, i32, i32, i32
  }
}

</mosaic_0001>

<bundles_post_ra>
// kernel: tpu_custom_call.1
= control target key start
LH: loop header
LB: loop body
LE: loop exit
PB: predicated region body
PF: predicated region fallthrough
CT: control target
= control target key end

     0   :  { %7 = vsyncpa [#allocation3], 0  ;;  %s521_s0 = inlined_call_operand.hbm [shape: f32[2,4,256], index: 0, kind: input, shape index: {}]   ;;  %s522_s1 = inlined_call_operand.hbm [shape: s32[2,1,256], index: 1, kind: input, shape index: {}]   ;;  %s523_s2 = inlined_call_operand.hbm [shape: f32[1,1,2,128], index: 2, kind: output, shape index: {}]  }
   0x1   :  { %8 = vsyncpa [#allocation6], 0 }
   0x2   :  { %9 = vsyncpa [#allocation4], 0  ;;  %s14_s11 = sshll.u32 %s521_s0, 4  ;;  %s414_s12 = smov [#allocation2]   ;;  %s15_s11 = int_to_ptr.hbm [resolvable:$true] %s14_s11 }
   0x3   :  { %s16_s13 = sshll.u32 %s414_s12, 4  ;;  %s27_s16 = sshll.u32 %s522_s1, 4  ;;  %s17_s13 = int_to_ptr.vmem [resolvable:$true] %s16_s13  ;;  %s28_s16 = int_to_ptr.hbm [resolvable:$true] %s27_s16 }
   0x4   :  { %s415_s17 = smov 128   ;;  %s416_s18 = smov 8  }
   0x5   :  { %22 = dma.hbm_to_vmem [thread:$0]  %s15_s11, 256, %s17_s13, [#allocation3], %s415_s17, %s415_s17, %s416_s18  }
   0x6   :  { %s417_s19 = smov [#allocation5]   ;;  %s418_s21 = smov 32  }
   0x7   :  { %s29_s20 = sshll.u32 %s417_s19, 4  ;;  %s419_s22 = smov 2   ;;  %s30_s20 = int_to_ptr.vmem [resolvable:$true] %s29_s20 }
   0x8   :  { %35 = dma.hbm_to_vmem [thread:$0]  %s28_s16, 64, %s30_s20, [#allocation6], %s418_s21, %s418_s21, %s419_s22  }
   0x9   :  { %408 = dma.done.wait [#allocation3], 256  }
   0xa   :  { %409 = vsyncadd [#allocation3], 4294967040 }
   0xb   :  { %410 = dma.done.wait [#allocation6], 64  }
   0xc   :  { %411 = vsyncadd [#allocation6], 4294967232  ;;  %v44_v0 = vld [vmem:[#allocation2] sm:$0xff]  ;;  %v45_v1 = vld [vmem:[#allocation2 + $0x8] sm:$0xff]  ;;  %vm65_vm0 = vcmask 1043456   ;;  %v159_v46 = vlaneseq  ;;  %vm224_vm7 = vcmask 1040384  }
   0xd   :  { %54 = vst [vmem:[#allocation1] ss:$2 sm:$0xff] %v44_v0  ;;  %v449_v44 = vld [vmem:[#allocation5] sm:$0x3]  ;;  %v451_v45 = vld [vmem:[#allocation5 + $0x2] sm:$0x3] }
   0xe   :  { %58 = vst [vmem:[#allocation1 + $0x10] ss:$2 sm:$0xff] %v45_v1  ;;  %vm48_vm1 = vcmp.ne.s32.totalorder %v449_v44, 255  ;;  %vm49_vm2 = vcmp.ne.s32.totalorder %v451_v45, 255  ;;  %v461_v49 = vshrl.u32 %v159_v46, 7  ;;  %s421_s0 = smov [#allocation7]  }
   0xf   :  { %v50_v47 = vsel %vm48_vm1, %v449_v44, 0  ;;  %v51_v48 = vsel %vm49_vm2, %v451_v45, 0  ;;  %s297_s1 = sshll.u32 %s421_s0, 4  ;;  %s299_s26 = sshll.u32 %s523_s2, 4  ;;  %s298_s1 = int_to_ptr.vmem [resolvable:$true] %s297_s1  ;;  %s300_s26 = int_to_ptr.hbm [resolvable:$true] %s299_s26 }
  0x10   :  { %v161_v62 = vperm.slane %v50_v47, 0  ;;  %v162_v63 = vperm.slane %v50_v47, 1  ;;  %vm287_vm8 = vcmp.eq.s32.totalorder %v461_v49, 0 }
  0x12   :  { %vm468_vm3 = vcmp.eq.s32.totalorder %v461_v49, %v161_v62  ;;  %vm473_vm4 = vcmp.eq.s32.totalorder %v461_v49, %v162_v63 }
  0x14   :  { %v55_v2 = vld.sshfl [vmem:[#allocation1] sm:$0xff pattern:$0x75316420]  ;;  %v56_v3 = vld.sshfl [vmem:[#allocation1 + $0x8] sm:$0xff pattern:$0x75316420] }
  0x15   :  { %v59_v4 = vld.sshfl [vmem:[#allocation1 + $0x10] sm:$0xff pattern:$0x75316420]  ;;  %v60_v5 = vld.sshfl [vmem:[#allocation1 + $0x18] sm:$0xff pattern:$0x75316420] }
  0x16   :  { %v66_v6 = vsel %vm65_vm0, %v55_v2, -inf  ;;  %v73_v7 = vsel %vm65_vm0, %v56_v3, -inf  ;;  %v80_v8 = vsel %vm65_vm0, %v59_v4, -inf  ;;  %v87_v9 = vsel %vm65_vm0, %v60_v5, -inf }
  0x17   :  { %v67_v10 = vrot.slane %v66_v6, 4  ;;  %v74_v11 = vrot.slane %v73_v7, 4  ;;  %v81_v12 = vrot.slane %v80_v8, 4  ;;  %v88_v13 = vrot.slane %v87_v9, 4 }
  0x19   :  { %v68_v14 = vmax.f32 %v66_v6, %v67_v10  ;;  %v75_v15 = vmax.f32 %v73_v7, %v74_v11  ;;  %v82_v16 = vmax.f32 %v80_v8, %v81_v12  ;;  %v89_v17 = vmax.f32 %v87_v9, %v88_v13 }
  0x1a   :  { %v420_v13 = vmov 0.0  }
  0x1b   :  { %v69_v18 = vrot.slane %v68_v14, 2  ;;  %v76_v19 = vrot.slane %v75_v15, 2  ;;  %v83_v20 = vrot.slane %v82_v16, 2  ;;  %v90_v21 = vrot.slane %v89_v17, 2 }
  0x1d   :  { %v70_v22 = vmax.f32 %v68_v14, %v69_v18  ;;  %v77_v23 = vmax.f32 %v75_v15, %v76_v19  ;;  %v84_v24 = vmax.f32 %v82_v16, %v83_v20  ;;  %v91_v25 = vmax.f32 %v89_v17, %v90_v21 }
  0x1f   :  { %v71_v26 = vrot.slane %v70_v22, 1  ;;  %v78_v27 = vrot.slane %v77_v23, 1  ;;  %v85_v28 = vrot.slane %v84_v24, 1  ;;  %v92_v29 = vrot.slane %v91_v25, 1 }
  0x21   :  { %v72_v30 = vmax.f32 %v70_v22, %v71_v26  ;;  %v79_v31 = vmax.f32 %v77_v23, %v78_v27  ;;  %v86_v32 = vmax.f32 %v84_v24, %v85_v28  ;;  %v93_v33 = vmax.f32 %v91_v25, %v92_v29 }
  0x23   :  { %v98_v34 = vrot.slane %v79_v31, 4  ;;  %v99_v35 = vrot.slane %v93_v33, 4 }
  0x25   :  { %v100_v36 = vsel %vm65_vm0, %v72_v30, %v98_v34  ;;  %v101_v37 = vsel %vm65_vm0, %v86_v32, %v99_v35 }
  0x26   :  { %v104_v38 = vsub.f32 %v44_v0, %v100_v36  ;;  %v105_v39 = vsub.f32 %v45_v1, %v101_v37  ;;  %v163_v0 = vperm.slane %v51_v48, 0  ;;  %v164_v1 = vperm.slane %v51_v48, 1 }
  0x28   :  { %v106_v40 = vmul.f32 1.442695, %v104_v38  ;;  %v108_v41 = vmul.f32 1.442695, %v105_v39  ;;  %vm478_vm5 = vcmp.eq.s32.totalorder %v461_v49, %v163_v0  ;;  %vm483_vm6 = vcmp.eq.s32.totalorder %v461_v49, %v164_v1 }
  0x2a   :  { %324 = vpow2.f32 %v106_v40 }
  0x2b   :  { %326 = vpow2.f32 %v108_v41 }
  0x30   :  { %v325_v42 = vpop.eup %324 }
  0x31   :  { %v327_v43 = vpop.eup %326  ;;  %112 = vst [vmem:[#allocation1] ss:$2 sm:$0xff] %v325_v42 }
  0x32   :  { %116 = vst [vmem:[#allocation1 + $0x10] ss:$2 sm:$0xff] %v327_v43 }
  0x38   :  { %v113_v50 = vld.sshfl [vmem:[#allocation1] sm:$0xff pattern:$0x75316420]  ;;  %v114_v51 = vld.sshfl [vmem:[#allocation1 + $0x8] sm:$0xff pattern:$0x75316420] }
  0x39   :  { %v117_v52 = vld.sshfl [vmem:[#allocation1 + $0x10] sm:$0xff pattern:$0x75316420]  ;;  %v118_v53 = vld.sshfl [vmem:[#allocation1 + $0x18] sm:$0xff pattern:$0x75316420] }
  0x3a   :  { %v123_v54 = vsel %vm65_vm0, %v113_v50, 0.0  ;;  %v130_v55 = vsel %vm65_vm0, %v114_v51, 0.0  ;;  %v137_v56 = vsel %vm65_vm0, %v117_v52, 0.0  ;;  %v144_v57 = vsel %vm65_vm0, %v118_v53, 0.0  ;;  %171 = vst [vmem:[#allocation1] ss:$2 sm:$0xff] %v104_v38 }
  0x3b   :  { %v124_v58 = vrot.slane %v123_v54, 4  ;;  %v131_v59 = vrot.slane %v130_v55, 4  ;;  %v138_v60 = vrot.slane %v137_v56, 4  ;;  %v145_v61 = vrot.slane %v144_v57, 4  ;;  %175 = vst [vmem:[#allocation1 + $0x10] ss:$2 sm:$0xff] %v105_v39 }
  0x3d   :  { %v125_v2 = vadd.f32 %v124_v58, %v123_v54  ;;  %v132_v3 = vadd.f32 %v131_v59, %v130_v55  ;;  %v139_v4 = vadd.f32 %v138_v60, %v137_v56  ;;  %v146_v5 = vadd.f32 %v145_v61, %v144_v57 }
  0x3f   :  { %v126_v6 = vrot.slane %v125_v2, 2  ;;  %v133_v7 = vrot.slane %v132_v3, 2  ;;  %v140_v8 = vrot.slane %v139_v4, 2  ;;  %v147_v9 = vrot.slane %v146_v5, 2 }
  0x41   :  { %v127_v14 = vadd.f32 %v126_v6, %v125_v2  ;;  %v134_v15 = vadd.f32 %v133_v7, %v132_v3  ;;  %v141_v16 = vadd.f32 %v140_v8, %v139_v4  ;;  %v148_v17 = vadd.f32 %v147_v9, %v146_v5  ;;  %v172_v18 = vld.sshfl [vmem:[#allocation1] sm:$0xff pattern:$0x75316420]  ;;  %v173_v19 = vld.sshfl [vmem:[#allocation1 + $0x8] sm:$0xff pattern:$0x75316420] }
  0x42   :  { %v176_v20 = vld.sshfl [vmem:[#allocation1 + $0x10] sm:$0xff pattern:$0x75316420]  ;;  %v177_v21 = vld.sshfl [vmem:[#allocation1 + $0x18] sm:$0xff pattern:$0x75316420] }
  0x43   :  { %v128_v22 = vrot.slane %v127_v14, 1  ;;  %v135_v23 = vrot.slane %v134_v15, 1  ;;  %v142_v24 = vrot.slane %v141_v16, 1  ;;  %v149_v25 = vrot.slane %v148_v17, 1 }
  0x44   :  { %v182_v26 = vsel %vm468_vm3, %v172_v18, 0.0  ;;  %v183_v27 = vsel %vm473_vm4, %v173_v19, 0.0  ;;  %v184_v28 = vsel %vm478_vm5, %v176_v20, 0.0  ;;  %v185_v29 = vsel %vm483_vm6, %v177_v21, 0.0 }
  0x45   :  { %v129_v30 = vadd.f32 %v128_v22, %v127_v14  ;;  %v136_v31 = vadd.f32 %v135_v23, %v134_v15  ;;  %v143_v32 = vadd.f32 %v142_v24, %v141_v16  ;;  %v150_v33 = vadd.f32 %v149_v25, %v148_v17 }
  0x46   :  { %v186_v34 = vsel %vm65_vm0, %v182_v26, 0.0  ;;  %v193_v35 = vsel %vm65_vm0, %v183_v27, 0.0  ;;  %v200_v36 = vsel %vm65_vm0, %v184_v28, 0.0  ;;  %v207_v37 = vsel %vm65_vm0, %v185_v29, 0.0 }
  0x47   :  { %328 = vlog2.f32 %v129_v30  ;;  %v187_v38 = vrot.slane %v186_v34, 4  ;;  %v194_v39 = vrot.slane %v193_v35, 4  ;;  %v201_v40 = vrot.slane %v200_v36, 4 }
  0x48   :  { %330 = vlog2.f32 %v136_v31  ;;  %v208_v41 = vrot.slane %v207_v37, 4  ;;  %v310_v14 = vsel %vm48_vm1, 1.0, %v420_v13  ;;  %v311_v18 = vsel %vm49_vm2, 1.0, %v420_v13 }
  0x49   :  { %332 = vlog2.f32 %v143_v32  ;;  %v188_v42 = vadd.f32 %v187_v38, %v186_v34  ;;  %v195_v43 = vadd.f32 %v194_v39, %v193_v35  ;;  %v202_v46 = vadd.f32 %v201_v40, %v200_v36 }
  0x4a   :  { %334 = vlog2.f32 %v150_v33  ;;  %v209_v47 = vadd.f32 %v208_v41, %v207_v37  ;;  %v263_v19 = vperm.slane %v310_v14, 0  ;;  %v264_v20 = vperm.slane %v310_v14, 1 }
  0x4b   :  { %v189_v48 = vrot.slane %v188_v42, 2  ;;  %v196_v50 = vrot.slane %v195_v43, 2  ;;  %v203_v51 = vrot.slane %v202_v46, 2  ;;  %v265_v28 = vperm.slane %v311_v18, 0 }
  0x4c   :  { %v210_v52 = vrot.slane %v209_v47, 2  ;;  %v271_v31 = vsel %vm224_vm7, %v263_v19, 0.0  ;;  %v272_v32 = vsel %vm224_vm7, %v264_v20, 0.0  ;;  %v266_v36 = vperm.slane %v311_v18, 1 }
  0x4d   :  { %v329_v53 = vpop.eup %328  ;;  %v190_v54 = vadd.f32 %v189_v48, %v188_v42  ;;  %v197_v55 = vadd.f32 %v196_v50, %v195_v43  ;;  %v204_v56 = vadd.f32 %v203_v51, %v202_v46  ;;  %v273_v35 = vadd.f32 %v272_v32, %v271_v31 }
  0x4e   :  { %v331_v57 = vpop.eup %330  ;;  %v152_v58 = vmul.f32 0.6931472, %v329_v53  ;;  %v211_v59 = vadd.f32 %v210_v52, %v209_v47  ;;  %v274_v37 = vsel %vm224_vm7, %v265_v28, 0.0  ;;  %v276_v40 = vsel %vm224_vm7, %v266_v36, 0.0 }
  0x4f   :  { %v333_v60 = vpop.eup %332  ;;  %v154_v61 = vmul.f32 0.6931472, %v331_v57  ;;  %v191_v62 = vrot.slane %v190_v54, 1  ;;  %v198_v63 = vrot.slane %v197_v55, 1  ;;  %v205_v0 = vrot.slane %v204_v56, 1 }
  0x50   :  { %v335_v1 = vpop.eup %334  ;;  %v156_v2 = vmul.f32 0.6931472, %v333_v60  ;;  %v212_v3 = vrot.slane %v211_v59, 1  ;;  %v275_v39 = vadd.f32 %v274_v37, %v273_v35 }
  0x51   :  { %v158_v4 = vmul.f32 0.6931472, %v335_v1  ;;  %v192_v5 = vadd.f32 %v191_v62, %v190_v54  ;;  %v199_v6 = vadd.f32 %v198_v63, %v197_v55  ;;  %v206_v7 = vadd.f32 %v205_v0, %v204_v56 }
  0x52   :  { %v213_v8 = vadd.f32 %v212_v3, %v211_v59  ;;  %v277_v41 = vadd.f32 %v276_v40, %v275_v39 }
  0x53   :  { %v214_v9 = vsub.f32 %v152_v58, %v192_v5  ;;  %v215_v10 = vsub.f32 %v154_v61, %v199_v6  ;;  %v216_v11 = vsub.f32 %v156_v2, %v206_v7 }
  0x54   :  { %v217_v12 = vsub.f32 %v158_v4, %v213_v8 }
  0x55   :  { %v222_v15 = vrot.slane %v215_v10, 7 }
  0x56   :  { %v223_v16 = vrot.slane %v217_v12, 7 }
  0x57   :  { %v225_v17 = vsel %vm224_vm7, %v214_v9, %v222_v15 }
  0x58   :  { %v226_v21 = vsel %vm224_vm7, %v216_v11, %v223_v16  ;;  %v229_v22 = vsel %vm48_vm1, %v225_v17, 0.0 }
  0x59   :  { %v230_v23 = vsel %vm49_vm2, %v226_v21, 0.0  ;;  %v233_v24 = vperm.slane %v229_v22, 0  ;;  %v234_v25 = vperm.slane %v229_v22, 1 }
  0x5a   :  { %v235_v26 = vperm.slane %v230_v23, 0  ;;  %v236_v27 = vperm.slane %v230_v23, 1 }
  0x5b   :  { %v241_v29 = vsel %vm224_vm7, %v233_v24, 0.0  ;;  %v242_v30 = vsel %vm224_vm7, %v234_v25, 0.0 }
  0x5c   :  { %v243_v33 = vadd.f32 %v242_v30, %v241_v29  ;;  %v244_v44 = vsel %vm224_vm7, %v235_v26, 0.0  ;;  %v246_v34 = vsel %vm224_vm7, %v236_v27, 0.0 }
  0x5e   :  { %v245_v45 = vadd.f32 %v244_v44, %v243_v33 }
  0x60   :  { %v247_v38 = vadd.f32 %v246_v34, %v245_v45 }
  0x62   :  { %248 = vadd.xlane.f32.xlu0 %v247_v38 }
  0x6a   :  { %278 = vadd.xlane.f32.xlu0 %v277_v41 }
  0xd5   :  { %v249_v42 = vpop.xlane.xlu0 %248 }
  0xd6   :  { %v250_v43 = vrot.slane %v249_v42, 4 }
  0xd8   :  { %v251_v46 = vadd.f32 %v250_v43, %v249_v42 }
  0xda   :  { %v252_v47 = vrot.slane %v251_v46, 2 }
  0xdc   :  { %v253_v48 = vadd.f32 %v252_v47, %v251_v46 }
  0xdd   :  { %v279_v50 = vpop.xlane.xlu0 %278 }
  0xde   :  { %v280_v51 = vrot.slane %v279_v50, 4  ;;  %v254_v52 = vrot.slane %v253_v48, 1 }
  0xe0   :  { %v281_v53 = vadd.f32 %v280_v51, %v279_v50  ;;  %v255_v54 = vadd.f32 %v254_v52, %v253_v48 }
  0xe2   :  { %v282_v55 = vrot.slane %v281_v53, 2  ;;  %312 = vpush %v255_v54 }
  0xe4   :  { %v283_v56 = vadd.f32 %v282_v55, %v281_v53 }
  0xe6   :  { %v284_v57 = vrot.slane %v283_v56, 1 }
  0xe8   :  { %v285_v58 = vadd.f32 %v284_v57, %v283_v56 }
  0xea   :  { %314 = vpush %v285_v58 }
 0x113   :  { %s313_s23 = spop %312 }
 0x114   :  { %v288_v59 = vstv %s313_s23 }
 0x11b   :  { %s315_s27 = spop %314 }
 0x11c   :  { %v289_v60 = vstv %s315_s27 }
 0x11d   :  { %v290_v61 = vsel %vm287_vm8, %v288_v59, %v289_v60 }
 0x11e   :  { %291 = vst [vmem:[#allocation7] sm:$0x3] %v290_v61 }
 0x11f   :  { %302 = dma.vmem_to_hbm [thread:$0]  %s298_s1, 32, %s300_s26, [#allocation4]  }
 0x120   :  { %412 = dma.done.wait [#allocation4], 32  }
 0x121   :  { %413 = vsyncadd [#allocation4], 4294967264 }
 0x122   :  { %307 = vsyncpa [#allocation3], 1 }
 0x123   :  { %308 = vsyncpa [#allocation6], 1 }
 0x124   :  { %309 = vsyncpa [#allocation4], 1 }

</bundles_post_ra>
